<compile_context>
chip_gen: v7x
topology: tpu7x:2x2x1
jax: 0.10.0
libtpu: 0.0.40
codegen_flags: <defaults>
</compile_context>

<pallas_src>
import functools

import jax
import jax.numpy as jnp
from jax.experimental import pallas as pl
from jax.experimental.pallas import tpu as pltpu


def _round_up(x, m):
    return (x + m - 1) // m * m


def _num_tensorcores_per_chip():
    """2 TCs per chip on v7x-class devices, 1 on v5e/v6e. Safe fallback: 1."""
    try:
        kind = jax.devices()[0].device_kind.lower()
        if "v7" in kind:
            return 2
    except Exception:
        pass
    return 1


def _pick_batch_tile(B, tile_b, num_tc):
    """Batch tile: multiple of 8, <= tile_b, minimal padding, and only as many
    grid steps as there are TensorCores to feed (grid is a serial loop on a
    single-TC chip, so extra steps are pure overhead)."""
    per_core = _round_up((B + num_tc - 1) // num_tc, 8)
    tile = _round_up(min(tile_b, per_core), 8)
    Bp = _round_up(B, tile)
    return tile, Bp


def _fused_graph_kernel(x_ref, wf_ref, b1_ref, w2_ref, b2_ref, o_ref, *, h_pad):
    # x: (TB, Fp) f32 (cast to bf16 here -> no extra host-side HBM pass).
    # wf = [W1 | Ws]: (Fp, Hp+Op) bf16 (resident).  w2: (Hp, Op) bf16 (resident).
    x = x_ref[...].astype(wf_ref.dtype)

    # One wide MXU matmul covers both x@W1 and x@Ws (they share the same x).
    xw = jnp.dot(x, wf_ref[...], preferred_element_type=jnp.float32)  # (TB, Hp+Op) f32

    # Lane-aligned slices (h_pad is a multiple of 128).
    h = jnp.abs(xw[:, :h_pad] + b1_ref[...])   # bias add + __abs__ in f32
    skip = xw[:, h_pad:]                       # the x @ Ws branch, f32

    # Second matmul: bf16 inputs, f32 accumulation.
    y = jnp.dot(h.astype(w2_ref.dtype), w2_ref[...],
                preferred_element_type=jnp.float32)

    # bias add + AddOpLayer residual in f32, lane-dense store.
    o_ref[...] = (y + b2_ref[...] + skip).astype(o_ref.dtype)


def functional_model_forward(x, w1, b1, w2, b2, ws, *, tile_b=256,
                             out_dtype=jnp.float32):
    B, F = x.shape
    H = w1.shape[1]
    O = w2.shape[1]

    # Lane-dense / MXU-friendly padded dims.
    Fp = _round_up(F, 128)
    Hp = _round_up(H, 128)
    Op = _round_up(O, 128)

    num_tc = _num_tensorcores_per_chip()
    tb, Bp = _pick_batch_tile(B, tile_b, num_tc)

    f32, bf16 = jnp.float32, jnp.bfloat16

    # x stays f32 and is only zero-padded if its shape is misaligned (the bf16
    # cast happens inside the kernel). Weights are tiny one-time host preps.
    if (Bp, Fp) == (B, F):
        xp = x.astype(f32)
    else:
        xp = jnp.zeros((Bp, Fp), f32).at[:B, :F].set(x.astype(f32))
    w1p = jnp.zeros((Fp, Hp), f32).at[:F, :H].set(w1.astype(f32)).astype(bf16)
    wsp = jnp.zeros((Fp, Op), f32).at[:F, :O].set(ws.astype(f32)).astype(bf16)
    wf = jnp.concatenate([w1p, wsp], axis=1)                       # (Fp, Hp+Op)
    w2p = jnp.zeros((Hp, Op), f32).at[:H, :O].set(w2.astype(f32)).astype(bf16)
    b1p = jnp.zeros((1, Hp), f32).at[:, :H].set(b1.astype(f32))
    b2p = jnp.zeros((1, Op), f32).at[:, :O].set(b2.astype(f32))

    grid = (Bp // tb,)

    out_itemsize = jnp.dtype(out_dtype).itemsize
    flops = 2 * Bp * (Fp * (Hp + Op) + Hp * Op)
    bytes_accessed = (xp.size * 4 + wf.size * 2 + w2p.size * 2
                      + b1p.size * 4 + b2p.size * 4 + Bp * Op * out_itemsize)

    # Explicit VMEM budget (double-buffered streamed blocks, resident weights
    # x2 for the default pipeliner, f32 intermediates), clamped to v7x's 64 MiB.
    vmem_budget = (2 * tb * Fp * 4                     # x blocks (f32)
                   + 2 * tb * Op * out_itemsize        # out blocks
                   + 2 * (wf.size * 2 + w2p.size * 2 + b1p.size * 4 + b2p.size * 4)
                   + tb * (Hp + Op) * 4                # xw f32
                   + tb * Hp * (4 + 2)                 # h f32 + h bf16
                   + tb * Op * 4)                      # y f32
    vmem_limit = int(min(max(2 * vmem_budget, 32 << 20), 64 << 20))

    out_padded = pl.pallas_call(
        functools.partial(_fused_graph_kernel, h_pad=Hp),
        out_shape=jax.ShapeDtypeStruct((Bp, Op), out_dtype),
        grid_spec=pltpu.PrefetchScalarGridSpec(
            num_scalar_prefetch=0,
            grid=grid,
            in_specs=[
                pl.BlockSpec((tb, Fp), lambda i: (i, 0)),        # x: tiled over batch
                pl.BlockSpec((Fp, Hp + Op), lambda i: (0, 0)),   # [W1 | Ws] (resident)
                pl.BlockSpec((1, Hp), lambda i: (0, 0)),         # b1
                pl.BlockSpec((Hp, Op), lambda i: (0, 0)),        # W2 (resident)
                pl.BlockSpec((1, Op), lambda i: (0, 0)),         # b2
            ],
            out_specs=pl.BlockSpec((tb, Op), lambda i: (i, 0)),
        ),
        compiler_params=pltpu.CompilerParams(
            dimension_semantics=("parallel",),
            vmem_limit_bytes=vmem_limit,
        ),
        cost_estimate=pl.CostEstimate(
            flops=int(flops), transcendentals=0,
            bytes_accessed=int(bytes_accessed)),
    )(xp, wf, b1p, w2p, b2p)

    # Strip batch / feature padding.
    return out_padded[:B, :O]


def _reference_forward(x, w1, b1, w2, b2, ws):
    # Pure f32 reference of the functional graph.
    h = jnp.abs(x @ w1 + b1)
    return h @ w2 + b2 + x @ ws


if __name__ == "__main__":
    # Small, deliberately non-128-aligned shapes to exercise the padding path.
    B, F, H, O = 200, 96, 192, 80

    key = jax.random.PRNGKey(0)
    kx, k1, kb1, k2, kb2, ks = jax.random.split(key, 6)

    x = jax.random.normal(kx, (B, F), dtype=jnp.float32)
    w1 = jax.random.normal(k1, (F, H), dtype=jnp.float32) * 0.1
    b1 = jax.random.normal(kb1, (1, H), dtype=jnp.float32) * 0.1
    w2 = jax.random.normal(k2, (H, O), dtype=jnp.float32) * 0.1
    b2 = jax.random.normal(kb2, (1, O), dtype=jnp.float32) * 0.1
    ws = jax.random.normal(ks, (F, O), dtype=jnp.float32) * 0.1

    out = functional_model_forward(x, w1, b1, w2, b2, ws)
    out = jax.block_until_ready(out)

    ref = _reference_forward(x, w1, b1, w2, b2, ws)
    assert out.shape == (B, O)
    # Tolerance loosened for the intentional bf16 matmul inputs (f32 accumulation).
    assert jnp.allclose(out, ref, atol=5e-2, rtol=5e-2), "mismatch vs reference"

    print("KERNEL_OK")
</pallas_src>

<mosaic_0001>
module attributes {stable_mosaic.version = 11 : i64} {
  func.func @_fused_graph_kernel(%arg0: i32, %arg1: memref<200x128xf32, #tpu.memory_space<vmem>>, %arg2: memref<128x384xbf16, #tpu.memory_space<vmem>>, %arg3: memref<1x256xf32, #tpu.memory_space<vmem>>, %arg4: memref<256x128xbf16, #tpu.memory_space<vmem>>, %arg5: memref<1x128xf32, #tpu.memory_space<vmem>>, %arg6: memref<200x128xf32, #tpu.memory_space<vmem>>) attributes {dimension_semantics = [#tpu.dimension_semantics<parallel>], iteration_bounds = array<i64: 1>, scalar_prefetch = 0 : i64, scratch_operands = 0 : i64, tpu.core_type = #tpu.core_type<tc>, window_params = [{transform_indices = @transform_0, window_bounds = array<i64: 200, 128>}, {pipeline_mode = #tpu.pipeline_mode<synchronous>, transform_indices = @transform_1, window_bounds = array<i64: 128, 384>}, {pipeline_mode = #tpu.pipeline_mode<synchronous>, transform_indices = @transform_2, window_bounds = array<i64: 1, 256>}, {pipeline_mode = #tpu.pipeline_mode<synchronous>, transform_indices = @transform_3, window_bounds = array<i64: 256, 128>}, {pipeline_mode = #tpu.pipeline_mode<synchronous>, transform_indices = @transform_4, window_bounds = array<i64: 1, 128>}, {transform_indices = @transform_5, window_bounds = array<i64: 200, 128>}]} {
    %c0 = arith.constant 0 : index
    %c0_0 = arith.constant 0 : index
    %0 = vector.load %arg1[%c0, %c0_0] : memref<200x128xf32, #tpu.memory_space<vmem>>, vector<200x128xf32>
    %1 = arith.truncf %0 : vector<200x128xf32> to vector<200x128xbf16>
    %c0_1 = arith.constant 0 : index
    %c0_2 = arith.constant 0 : index
    %2 = vector.load %arg2[%c0_1, %c0_2] : memref<128x384xbf16, #tpu.memory_space<vmem>>, vector<128x384xbf16>
    %cst = arith.constant dense<0.000000e+00> : vector<200x384xf32>
    %3 = tpu.matmul %1, %2, %cst {dimension_numbers = #tpu.dot_dimension_numbers<[1], [0], [0], [1], [0, 0, 1, 1], [], []>} : vector<200x128xbf16>, vector<128x384xbf16>, vector<200x384xf32> -> vector<200x384xf32>
    %4 = vector.extract_strided_slice %3 {offsets = [0, 0], sizes = [200, 256], strides = [1, 1]} : vector<200x384xf32> to vector<200x256xf32>
    %c0_3 = arith.constant 0 : index
    %c0_4 = arith.constant 0 : index
    %5 = vector.load %arg3[%c0_3, %c0_4] : memref<1x256xf32, #tpu.memory_space<vmem>>, vector<1x256xf32>
    %6 = vector.broadcast %5 : vector<1x256xf32> to vector<200x256xf32>
    %7 = arith.addf %4, %6 : vector<200x256xf32>
    %8 = math.absf %7 : vector<200x256xf32>
    %9 = vector.extract_strided_slice %3 {offsets = [0, 256], sizes = [200, 128], strides = [1, 1]} : vector<200x384xf32> to vector<200x128xf32>
    %10 = arith.truncf %8 : vector<200x256xf32> to vector<200x256xbf16>
    %c0_5 = arith.constant 0 : index
    %c0_6 = arith.constant 0 : index
    %11 = vector.load %arg4[%c0_5, %c0_6] : memref<256x128xbf16, #tpu.memory_space<vmem>>, vector<256x128xbf16>
    %cst_7 = arith.constant dense<0.000000e+00> : vector<200x128xf32>
    %12 = tpu.matmul %10, %11, %cst_7 {dimension_numbers = #tpu.dot_dimension_numbers<[1], [0], [0], [1], [0, 0, 1, 1], [], []>} : vector<200x256xbf16>, vector<256x128xbf16>, vector<200x128xf32> -> vector<200x128xf32>
    %c0_8 = arith.constant 0 : index
    %c0_9 = arith.constant 0 : index
    %13 = vector.load %arg5[%c0_8, %c0_9] : memref<1x128xf32, #tpu.memory_space<vmem>>, vector<1x128xf32>
    %14 = vector.broadcast %13 : vector<1x128xf32> to vector<200x128xf32>
    %15 = arith.addf %12, %14 : vector<200x128xf32>
    %16 = arith.addf %15, %9 : vector<200x128xf32>
    %c0_10 = arith.constant 0 : index
    %c0_11 = arith.constant 0 : index
    %17 = vector.load %arg6[%c0_10, %c0_11] : memref<200x128xf32, #tpu.memory_space<vmem>>, vector<200x128xf32>
    tpu.vector_store %arg6[%c0_10, %c0_11], %16 {strides = array<i32>} : memref<200x128xf32, #tpu.memory_space<vmem>>, vector<200x128xf32>,
    return
  }
  func.func @transform_0(%arg0: i32) -> (i32, i32) {
    %c0_i32 = arith.constant 0 : i32
    %c0_i32_0 = arith.constant 0 : i32
    return %arg0, %c0_i32 : i32, i32
  }
  func.func @transform_1(%arg0: i32) -> (i32, i32) {
    %c0_i32 = arith.constant 0 : i32
    %c0_i32_0 = arith.constant 0 : i32
    %c0_i32_1 = arith.constant 0 : i32
    return %c0_i32, %c0_i32_0 : i32, i32
  }
  func.func @transform_2(%arg0: i32) -> (i32, i32) {
    %c0_i32 = arith.constant 0 : i32
    %c0_i32_0 = arith.constant 0 : i32
    %c0_i32_1 = arith.constant 0 : i32
    return %c0_i32, %c0_i32_0 : i32, i32
  }
  func.func @transform_3(%arg0: i32) -> (i32, i32) {
    %c0_i32 = arith.constant 0 : i32
    %c0_i32_0 = arith.constant 0 : i32
    %c0_i32_1 = arith.constant 0 : i32
    return %c0_i32, %c0_i32_0 : i32, i32
  }
  func.func @transform_4(%arg0: i32) -> (i32, i32) {
    %c0_i32 = arith.constant 0 : i32
    %c0_i32_0 = arith.constant 0 : i32
    %c0_i32_1 = arith.constant 0 : i32
    return %c0_i32, %c0_i32_0 : i32, i32
  }
  func.func @transform_5(%arg0: i32) -> (i32, i32) {
    %c0_i32 = arith.constant 0 : i32
    %c0_i32_0 = arith.constant 0 : i32
    return %arg0, %c0_i32 : i32, i32
  }
}

</mosaic_0001>

<bundles_post_ra>
// kernel: tpu_custom_call.1
= control target key start
LH: loop header
LB: loop body
LE: loop exit
PB: predicated region body
PF: predicated region fallthrough
CT: control target
= control target key end

     0   :  { %10 = vsyncpa [#allocation3], 0  ;;  %s1788_s0 = inlined_call_operand.hbm [shape: f32[200,128], index: 0, kind: input, shape index: {}]   ;;  %s1789_s1 = inlined_call_operand.hbm [shape: bf16[128,384], index: 1, kind: input, shape index: {}]   ;;  %s1790_s2 = inlined_call_operand.vmem [shape: f32[1,256], index: 2, kind: input, shape index: {}]   ;;  %s1791_s3 = inlined_call_operand.hbm [shape: bf16[256,128], index: 3, kind: input, shape index: {}]   ;;  %s1792_s4 = inlined_call_operand.vmem [shape: f32[1,128], index: 4, kind: input, shape index: {}]   ;;  %s1793_s5 = inlined_call_operand.hbm [shape: f32[200,128], index: 5, kind: output, shape index: {}]  }
   0x1   :  { %11 = vsyncpa [#allocation6], 0 }
   0x2   :  { %12 = vsyncpa [#allocation4], 0  ;;  %s1430_s18 = smov [#allocation5]   ;;  %s1336_s22 = scalar_lea.hbm %s1789_s1, 3072 }
   0x3   :  { %s30_s19 = sshll.u32 %s1430_s18, 4  ;;  %p1337_p0 = scmp.ne.s32.totalorder %s1789_s1, %s1336_s22  ;;  %s31_s19 = int_to_ptr.vmem [resolvable:$true] %s30_s19 }
   0x4   :  { %p1340_p1 = scmp.lt.u32.totalorder %s1336_s22, %s1789_s1 }
   0x6   :  { %p1342_p2 = pnand %p1340_p1, %p1337_p0 }
   0x8   :  { %1345 = shalt.err (!%p1342_p2)
}
   0x9   :  { %s1346_s27 = scalar_lea.vmem %s31_s19, 3072  ;;  %p1351_p4 = scmp.lt.s32.totalorder %s31_s19, %s31_s19 }
   0xa   :  { %p1347_p3 = scmp.ne.s32.totalorder %s31_s19, %s1346_s27  ;;  %p1352_p5 = scmp.lt.s32.totalorder %s1346_s27, %s1346_s27 }
   0xc   :  { %p1353_p6 = por %p1352_p5, %p1351_p4 }
   0xe   :  { %p1354_p7 = pnand %p1353_p6, %p1347_p3 }
  0x10   :  { %1357 = shalt.err (!%p1354_p7)
}
  0x11   :  { %s1431_s28 = smov 192   ;;  %s1432_s29 = smov 12  }
  0x12   :  { %36 = dma.hbm_to_vmem [thread:$0]  %s1789_s1, 3072, %s31_s19, [#allocation6], %s1431_s28, %s1431_s28, %s1432_s29  }
  0x13   :  { %s1433_s7 = smov [#allocation2]   ;;  %s1358_s11 = scalar_lea.hbm %s1788_s0, 3200 }
  0x14   :  { %s18_s8 = sshll.u32 %s1433_s7, 4  ;;  %p1359_p8 = scmp.ne.s32.totalorder %s1788_s0, %s1358_s11  ;;  %s19_s8 = int_to_ptr.vmem [resolvable:$true] %s18_s8 }
  0x15   :  { %p1362_p9 = scmp.lt.u32.totalorder %s1358_s11, %s1788_s0 }
  0x17   :  { %p1364_p10 = pnand %p1362_p9, %p1359_p8 }
  0x19   :  { %1367 = shalt.err (!%p1364_p10)
}
  0x1a   :  { %s1368_s16 = scalar_lea.vmem %s19_s8, 3200  ;;  %p1373_p12 = scmp.lt.s32.totalorder %s19_s8, %s19_s8 }
  0x1b   :  { %p1369_p11 = scmp.ne.s32.totalorder %s19_s8, %s1368_s16  ;;  %p1374_p13 = scmp.lt.s32.totalorder %s1368_s16, %s1368_s16 }
  0x1d   :  { %p1375_p0 = por %p1374_p13, %p1373_p12 }
  0x1f   :  { %p1376_p1 = pnand %p1375_p0, %p1369_p11 }
  0x21   :  { %1379 = shalt.err (!%p1376_p1)
}
  0x22   :  { %s1434_s1 = smov 128   ;;  %s1435_s17 = smov 8  }
  0x23   :  { %24 = dma.hbm_to_vmem [thread:$0]  %s1788_s0, 3200, %s19_s8, [#allocation3], %s1434_s1, %s1434_s1, %s1435_s17  }
  0x24   :  { %s1436_s20 = smov [#allocation7]   ;;  %s1380_s24 = scalar_lea.hbm %s1791_s3, 2048 }
  0x25   :  { %s44_s21 = sshll.u32 %s1436_s20, 4  ;;  %p1381_p2 = scmp.ne.s32.totalorder %s1791_s3, %s1380_s24  ;;  %s45_s21 = int_to_ptr.vmem [resolvable:$true] %s44_s21 }
  0x26   :  { %p1384_p3 = scmp.lt.u32.totalorder %s1380_s24, %s1791_s3 }
  0x28   :  { %p1386_p4 = pnand %p1384_p3, %p1381_p2 }
  0x2a   :  { %1389 = shalt.err (!%p1386_p4)
}
  0x2b   :  { %s1390_s29 = scalar_lea.vmem %s45_s21, 2048  ;;  %p1395_p6 = scmp.lt.s32.totalorder %s45_s21, %s45_s21 }
  0x2c   :  { %p1391_p5 = scmp.ne.s32.totalorder %s45_s21, %s1390_s29  ;;  %p1396_p7 = scmp.lt.s32.totalorder %s1390_s29, %s1390_s29 }
  0x2e   :  { %p1397_p8 = por %p1396_p7, %p1395_p6 }
  0x30   :  { %p1398_p9 = pnand %p1397_p8, %p1391_p5 }
  0x32   :  { %1401 = shalt.err (!%p1398_p9)
}
  0x33   :  { %s1437_s0 = smov 64   ;;  %s1438_s30 = smov 4  }
  0x34   :  { %50 = dma.hbm_to_vmem [thread:$0]  %s1791_s3, 2048, %s45_s21, [#allocation6], %s1437_s0, %s1437_s0, %s1438_s30  }
  0x35   :  { %1424 = dma.done.wait [#allocation3], 3200  }
  0x36   :  { %1425 = vsyncadd [#allocation3], 4294964096 }
  0x37   :  { %1426 = dma.done.wait [#allocation6], 5120  }
  0x38   :  { %1427 = vsyncadd [#allocation6], 4294962176  ;;  %v1439_v0 = vmov 0   ;;  %v1288_v1 = vld [vmem:[#allocation5 + $0x4] ss:$12 sps:$4 sm:$0xff]   ;;  %v63_v17 = vld [vmem:[#allocation2] sm:$0xff] }
  0x39   :  { %293 = vmatprep.mubr.bf16.mxu0 %v1439_v0  ;;  %363 = vmatprep.mubr.bf16.mxu1 %v1439_v0  ;;  %v1290_v2 = vld [vmem:[#allocation5] ss:$12 sps:$4 sm:$0xff]   ;;  %v1291_v3 = vld [vmem:[#allocation5 + $0x1c] ss:$12 sps:$4 sm:$0xff]   ;;  %v1293_v4 = vld [vmem:[#allocation5 + $0x18] ss:$12 sps:$4 sm:$0xff]  }
  0x3a   :  { %261 = vmatprep.subr.bf16.mxu0 %v1288_v1  ;;  %1259 = vmatprep.subr.bf16.mxu1 %v1288_v1  ;;  %v1294_v5 = vld [vmem:[#allocation5 + $0x34] ss:$12 sps:$4 sm:$0xff]   ;;  %v1296_v6 = vld [vmem:[#allocation5 + $0x30] ss:$12 sps:$4 sm:$0xff]   ;;  %v1297_v7 = vld [vmem:[#allocation5 + $0x4c] ss:$12 sps:$4 sm:$0xff]  }
  0x3b   :  { %262 = vmatpush1.bf16.msra.mxu0 %v1290_v2  ;;  %1267 = vmatpush1.bf16.msra.mxu1 %v1290_v2  ;;  %v1299_v8 = vld [vmem:[#allocation5 + $0x48] ss:$12 sps:$4 sm:$0xff]   ;;  %v1300_v9 = vld [vmem:[#allocation5 + $0x64] ss:$12 sps:$4 sm:$0xff]   ;;  %v1302_v10 = vld [vmem:[#allocation5 + $0x60] ss:$12 sps:$4 sm:$0xff]  }
  0x3c   :  { %263 = vmatprep.subr.bf16.mxu0 %v1291_v3  ;;  %1260 = vmatprep.subr.bf16.mxu1 %v1291_v3  ;;  %v1303_v11 = vld [vmem:[#allocation5 + $0x7c] ss:$12 sps:$4 sm:$0xff]   ;;  %v1305_v12 = vld [vmem:[#allocation5 + $0x78] ss:$12 sps:$4 sm:$0xff]   ;;  %v1306_v13 = vld [vmem:[#allocation5 + $0x94] ss:$12 sps:$4 sm:$0xff]  }
  0x3d   :  { %v1308_v14 = vld [vmem:[#allocation5 + $0x90] ss:$12 sps:$4 sm:$0xff]   ;;  %v1309_v15 = vld [vmem:[#allocation5 + $0xac] ss:$12 sps:$4 sm:$0xff]   ;;  %v1311_v16 = vld [vmem:[#allocation5 + $0xa8] ss:$12 sps:$4 sm:$0xff]  }
  0x3e   :  { %v64_v18 = vld [vmem:[#allocation2 + $0x8] sm:$0xff]  ;;  %v77_v19 = vld [vmem:[#allocation2 + $0x70] sm:$0xff]  ;;  %v78_v20 = vld [vmem:[#allocation2 + $0x78] sm:$0xff]  ;;  %v1440_v25 = vmov 0.0   ;;  %vm1441_vm0 = vmmov 0  }
  0x3f   :  { %264 = vmatpush1.bf16.msra.mxu0 %v1293_v4  ;;  %1268 = vmatpush1.bf16.msra.mxu1 %v1293_v4  ;;  %v1312_v21 = vld [vmem:[#allocation7 + $0x40] sm:$0xff]   ;;  %v1514_v22 = vpack.c.bf16 %v64_v18, %v63_v17  ;;  %v1516_v23 = vpack.c.bf16 %v78_v20, %v77_v19  ;;  %v1316_v26 = vld [vmem:[#allocation5 + $0x8] ss:$12 sps:$4 sm:$0xff]   ;;  %v79_v29 = vld [vmem:[#allocation2 + $0x80] sm:$0xff] }
  0x40   :  { %265 = vmatprep.subr.bf16.mxu0 %v1294_v5  ;;  %1261 = vmatprep.subr.bf16.mxu1 %v1294_v5  ;;  %v1313_v24 = vld [vmem:[#allocation7] sm:$0xff]   ;;  %v65_v27 = vld [vmem:[#allocation2 + $0x10] sm:$0xff]  ;;  %v66_v28 = vld [vmem:[#allocation2 + $0x18] sm:$0xff] }
  0x41   :  { %v1314_v30 = vld [vmem:[#allocation7 + $0x48] sm:$0xff]   ;;  %v80_v31 = vld [vmem:[#allocation2 + $0x88] sm:$0xff]  ;;  %v1317_v34 = vld [vmem:[#allocation7 + $0x50] sm:$0xff]   ;;  %v1524_v35 = vpack.c.bf16 %v66_v28, %v65_v27 }
  0x42   :  { %v1315_v32 = vld [vmem:[#allocation7 + $0x8] sm:$0xff]   ;;  %v1526_v36 = vpack.c.bf16 %v80_v31, %v79_v29  ;;  %v1318_v37 = vld [vmem:[#allocation7 + $0x10] sm:$0xff]   ;;  %v1322_v38 = vld [vmem:[#allocation5 + $0x38] ss:$12 sps:$4 sm:$0xff]  }
  0x43   :  { %266 = vmatpush1.bf16.msra.mxu0 %v1296_v6  ;;  %1269 = vmatpush1.bf16.msra.mxu1 %v1296_v6  ;;  %v1319_v33 = vld [vmem:[#allocation5 + $0x20] ss:$12 sps:$4 sm:$0xff]   ;;  %v1320_v39 = vld [vmem:[#allocation7 + $0x58] sm:$0xff]   ;;  %v82_v43 = vld [vmem:[#allocation2 + $0x98] sm:$0xff] }
  0x44   :  { %267 = vmatprep.subr.bf16.mxu0 %v1297_v7  ;;  %1262 = vmatprep.subr.bf16.mxu1 %v1297_v7  ;;  %v67_v40 = vld [vmem:[#allocation2 + $0x20] sm:$0xff]  ;;  %v68_v41 = vld [vmem:[#allocation2 + $0x28] sm:$0xff]  ;;  %v81_v42 = vld [vmem:[#allocation2 + $0x90] sm:$0xff] }
  0x45   :  { %v1321_v44 = vld [vmem:[#allocation7 + $0x18] sm:$0xff]   ;;  %v1323_v46 = vld [vmem:[#allocation7 + $0x60] sm:$0xff]   ;;  %v1534_v47 = vpack.c.bf16 %v68_v41, %v67_v40  ;;  %v1536_v48 = vpack.c.bf16 %v82_v43, %v81_v42  ;;  %v1328_v50 = vld [vmem:[#allocation5 + $0x68] ss:$12 sps:$4 sm:$0xff]  }
  0x46   :  { %v1325_v45 = vld [vmem:[#allocation5 + $0x50] ss:$12 sps:$4 sm:$0xff]   ;;  %v1324_v49 = vld [vmem:[#allocation7 + $0x20] sm:$0xff]   ;;  %v1326_v51 = vld [vmem:[#allocation7 + $0x68] sm:$0xff]  }
  0x47   :  { %268 = vmatpush1.bf16.msra.mxu0 %v1299_v8  ;;  %1270 = vmatpush1.bf16.msra.mxu1 %v1299_v8  ;;  %v69_v52 = vld [vmem:[#allocation2 + $0x30] sm:$0xff]  ;;  %v70_v53 = vld [vmem:[#allocation2 + $0x38] sm:$0xff]  ;;  %v83_v54 = vld [vmem:[#allocation2 + $0xa0] sm:$0xff] }
  0x48   :  { %269 = vmatprep.subr.bf16.mxu0 %v1300_v9  ;;  %1263 = vmatprep.subr.bf16.mxu1 %v1300_v9  ;;  %v84_v55 = vld [vmem:[#allocation2 + $0xa8] sm:$0xff]  ;;  %v1327_v56 = vld [vmem:[#allocation7 + $0x28] sm:$0xff]   ;;  %v1329_v58 = vld [vmem:[#allocation7 + $0x70] sm:$0xff]   ;;  %v91_v59 = vpack.c.bf16 %v70_v53, %v69_v52 }
  0x49   :  { %v1331_v57 = vld [vmem:[#allocation5 + $0x80] ss:$12 sps:$4 sm:$0xff]   ;;  %v1544_v60 = vpack.c.bf16 %v84_v55, %v83_v54  ;;  %v1330_v61 = vld [vmem:[#allocation7 + $0x30] sm:$0xff]   ;;  %v71_v62 = vld [vmem:[#allocation2 + $0x40] sm:$0xff] }
  0x4a   :  { %v72_v63 = vld [vmem:[#allocation2 + $0x48] sm:$0xff]  ;;  %v85_v1 = vld [vmem:[#allocation2 + $0xb0] sm:$0xff]  ;;  %v86_v2 = vld [vmem:[#allocation2 + $0xb8] sm:$0xff] }
  0x4b   :  { %270 = vmatpush1.bf16.msra.mxu0 %v1302_v10  ;;  %1271 = vmatpush1.bf16.msra.mxu1 %v1302_v10  ;;  %v92_v3 = vpack.c.bf16 %v72_v63, %v71_v62  ;;  %v99_v4 = vpack.c.bf16 %v86_v2, %v85_v1  ;;  %v73_v5 = vld [vmem:[#allocation2 + $0x50] sm:$0xff]  ;;  %v74_v6 = vld [vmem:[#allocation2 + $0x58] sm:$0xff]  ;;  %v87_v7 = vld [vmem:[#allocation2 + $0xc0] sm:$0xff] }
  0x4c   :  { %271 = vmatprep.subr.bf16.mxu0 %v1303_v11  ;;  %1264 = vmatprep.subr.bf16.mxu1 %v1303_v11  ;;  %v93_v8 = vpack.c.bf16 %v74_v6, %v73_v5  ;;  %v100_v9 = vpack.c.bf16 %v87_v7, %v87_v7  ;;  %v75_v10 = vld [vmem:[#allocation2 + $0x60] sm:$0xff]  ;;  %v76_v11 = vld [vmem:[#allocation2 + $0x68] sm:$0xff] }
  0x4d   :  { %v558_v19 = vld [vmem:[%s1790_s2] sm:$0x3] }
  0x4f   :  { %272 = vmatpush1.bf16.msra.mxu0 %v1305_v12  ;;  %1272 = vmatpush1.bf16.msra.mxu1 %v1305_v12  ;;  %v94_v12 = vpack.c.bf16 %v76_v11, %v75_v10 }
  0x50   :  { %273 = vmatprep.subr.bf16.mxu0 %v1306_v13  ;;  %1265 = vmatprep.subr.bf16.mxu1 %v1306_v13  ;;  %v1333_v13 = vld [vmem:[#allocation5 + $0x98] ss:$12 sps:$4 sm:$0xff]  }
  0x53   :  { %274 = vmatpush1.bf16.msra.mxu0 %v1308_v14  ;;  %1273 = vmatpush1.bf16.msra.mxu1 %v1308_v14  ;;  %v1332_v14 = vld [vmem:[#allocation7 + $0x78] sm:$0xff]  }
  0x54   :  { %275 = vmatprep.subr.bf16.mxu0 %v1309_v15  ;;  %1266 = vmatprep.subr.bf16.mxu1 %v1309_v15  ;;  %v1334_v15 = vld [vmem:[#allocation7 + $0x38] sm:$0xff]  }
  0x57   :  { %276 = vmatpush1.bf16.msra.mxu0 %v1311_v16  ;;  %1274 = vmatpush1.bf16.msra.mxu1 %v1311_v16  ;;  %v1335_v16 = vld [vmem:[#allocation5 + $0xb0] ss:$12 sps:$4 sm:$0xff]  }
  0x58   :  { %1097 = vmatprep.subr.bf16.mxu0 %v1312_v21  ;;  %1191 = vmatprep.subr.bf16.mxu1 %v1440_v25 }
  0x5a   :  { %294 = vmatmul.mubr.bf16.vlgmr.msra.gmra.mrb[0].mxu0 %v1514_v22  ;;  %364 = vmatmul.mubr.bf16.vlgmr.msra.gmra.mrb[0].mxu1 %v1516_v23 }
  0x5b   :  { %303 = vmatprep.mubr.bf16.mxu0 %v1439_v0  ;;  %373 = vmatprep.mubr.bf16.mxu1 %v1439_v0 }
  0x5c   :  { %1098 = vmatpush3.bf16.msra.mxu0 %v1313_v24  ;;  %1192 = vmatpush3.bf16.msra.mxu1 %v1316_v26 }
  0x5d   :  { %1099 = vmatprep.subr.bf16.mxu0 %v1314_v30  ;;  %1193 = vmatprep.subr.bf16.mxu1 %v1440_v25 }
  0x60   :  { %1100 = vmatpush3.bf16.msra.mxu0 %v1315_v32  ;;  %1194 = vmatpush3.bf16.msra.mxu1 %v1319_v33 }
  0x61   :  { %1101 = vmatprep.subr.bf16.mxu0 %v1317_v34  ;;  %1195 = vmatprep.subr.bf16.mxu1 %v1440_v25 }
  0x62   :  { %304 = vmatmul.mubr.bf16.gmra.mrb[4].mxu0 %v1524_v35  ;;  %374 = vmatmul.mubr.bf16.gmra.mrb[4].mxu1 %v1526_v36 }
  0x63   :  { %313 = vmatprep.mubr.bf16.mxu0 %v1439_v0  ;;  %383 = vmatprep.mubr.bf16.mxu1 %v1439_v0 }
  0x64   :  { %1102 = vmatpush3.bf16.msra.mxu0 %v1318_v37  ;;  %1196 = vmatpush3.bf16.msra.mxu1 %v1322_v38 }
  0x65   :  { %1103 = vmatprep.subr.bf16.mxu0 %v1320_v39  ;;  %1197 = vmatprep.subr.bf16.mxu1 %v1440_v25 }
  0x68   :  { %1104 = vmatpush3.bf16.msra.mxu0 %v1321_v44  ;;  %1198 = vmatpush3.bf16.msra.mxu1 %v1325_v45 }
  0x69   :  { %1105 = vmatprep.subr.bf16.mxu0 %v1323_v46  ;;  %1199 = vmatprep.subr.bf16.mxu1 %v1440_v25 }
  0x6a   :  { %314 = vmatmul.mubr.bf16.gmra.mrb[8].mxu0 %v1534_v47  ;;  %384 = vmatmul.mubr.bf16.gmra.mrb[8].mxu1 %v1536_v48 }
  0x6b   :  { %323 = vmatprep.mubr.bf16.mxu0 %v1439_v0  ;;  %393 = vmatprep.mubr.bf16.mxu1 %v1439_v0 }
  0x6c   :  { %1106 = vmatpush3.bf16.msra.mxu0 %v1324_v49  ;;  %1200 = vmatpush3.bf16.msra.mxu1 %v1328_v50 }
  0x6d   :  { %1107 = vmatprep.subr.bf16.mxu0 %v1326_v51  ;;  %1201 = vmatprep.subr.bf16.mxu1 %v1440_v25 }
  0x70   :  { %1108 = vmatpush3.bf16.msra.mxu0 %v1327_v56  ;;  %1202 = vmatpush3.bf16.msra.mxu1 %v1331_v57 }
  0x71   :  { %1109 = vmatprep.subr.bf16.mxu0 %v1329_v58  ;;  %1203 = vmatprep.subr.bf16.mxu1 %v1440_v25 }
  0x72   :  { %324 = vmatmul.mubr.bf16.gmra.mrb[12].mxu0 %v91_v59  ;;  %394 = vmatmul.mubr.bf16.gmra.mrb[12].mxu1 %v1544_v60 }
  0x73   :  { %333 = vmatprep.mubr.bf16.mxu0 %v1439_v0  ;;  %403 = vmatprep.mubr.bf16.mxu1 %v1439_v0 }
  0x74   :  { %1110 = vmatpush3.bf16.msra.mxu0 %v1330_v61  ;;  %1204 = vmatpush3.bf16.msra.mxu1 %v1333_v13 }
  0x75   :  { %1111 = vmatprep.subr.bf16.mxu0 %v1332_v14  ;;  %1205 = vmatprep.subr.bf16.mxu1 %v1440_v25 }
  0x78   :  { %1112 = vmatpush3.bf16.msra.mxu0 %v1334_v15  ;;  %1206 = vmatpush3.bf16.msra.mxu1 %v1335_v16 }
  0x7a   :  { %334 = vmatmul.mubr.bf16.gmra.mrb[16].mxu0 %v92_v3  ;;  %404 = vmatmul.mubr.bf16.gmra.mrb[16].mxu1 %v99_v4 }
  0x7b   :  { %343 = vmatprep.mubr.bf16.mxu0 %v1439_v0  ;;  %413 = vmatprep.mubr.bf16.mxu1 %v1439_v0 }
  0x82   :  { %344 = vmatmul.mubr.bf16.gmra.mrb[20].mxu0 %v93_v8  ;;  %414 = vmatmul.mubr.bf16.gmra.mrb[20].mxu1 %v100_v9 }
  0x83   :  { %353 = vmatprep.mubr.bf16.mxu0 %v1439_v0  ;;  %1207 = vmatprep.mubr.msk.bf16.mxu1 %vm1441_vm0, %v1440_v25  ;;  %v560_v0 = vlaneseq }
  0x85   :  { %v561_v17 = vshrl.u32 %v560_v0, 7 }
  0x87   :  { %v562_v18 = vsub.s32 0, %v561_v17  ;;  %v566_v20 = vsub.s32 1, %v561_v17 }
  0x89   :  { %v1590_v21 = vrot.slane %v558_v19, %v562_v18 }
  0x8a   :  { %354 = vmatmul.mubr.bf16.gmra.mrb[24].mxu0 %v94_v12  ;;  %1208 = vmatmul.mubr.bf16.vlgmr.msra.gmra.mrb[24].mxu1 %v1514_v22  ;;  %v1592_v22 = vrot.slane %v558_v19, %v566_v20 }
  0x8b   :  { %1211 = vmatprep.mubr.msk.bf16.mxu1 %vm1441_vm0, %v1440_v25 }
  0x92   :  { %1212 = vmatmul.mubr.bf16.gmra.mrb[28].mxu1 %v1524_v35 }
  0x93   :  { %1215 = vmatprep.mubr.msk.bf16.mxu1 %vm1441_vm0, %v1440_v25 }
  0x9a   :  { %1216 = vmatmul.mubr.bf16.gmra.mrb[32].mxu1 %v1534_v47 }
  0x9b   :  { %1219 = vmatprep.mubr.msk.bf16.mxu1 %vm1441_vm0, %v1440_v25 }
  0xa2   :  { %1220 = vmatmul.mubr.bf16.gmra.mrb[36].mxu1 %v91_v59 }
  0xa3   :  { %1223 = vmatprep.mubr.msk.bf16.mxu1 %vm1441_vm0, %v1440_v25 }
  0xaa   :  { %1224 = vmatmul.mubr.bf16.gmra.mrb[40].mxu1 %v92_v3 }
  0xab   :  { %1227 = vmatprep.mubr.msk.bf16.mxu1 %vm1441_vm0, %v1440_v25 }
  0xb2   :  { %1228 = vmatmul.mubr.bf16.gmra.mrb[44].mxu1 %v93_v8 }
  0xb3   :  { %1231 = vmatprep.mubr.msk.bf16.mxu1 %vm1441_vm0, %v1440_v25 }
  0xba   :  { %1232 = vmatmul.mubr.bf16.gmra.mrb[48].mxu1 %v94_v12 }
  0xbb   :  { %1235 = vmatprep.mubr.msk.bf16.mxu1 %vm1441_vm0, %v1440_v25 }
  0xc2   :  { %1236 = vmatmul.mubr.bf16.gmra.mrb[52].mxu1 %v1516_v23 }
  0xc3   :  { %1239 = vmatprep.mubr.msk.bf16.mxu1 %vm1441_vm0, %v1440_v25 }
  0xca   :  { %1240 = vmatmul.mubr.bf16.gmra.mrb[56].mxu1 %v1526_v36 }
  0xcb   :  { %1243 = vmatprep.mubr.msk.bf16.mxu1 %vm1441_vm0, %v1440_v25 }
  0xd2   :  { %1244 = vmatmul.mubr.bf16.gmra.mrb[60].mxu1 %v1536_v48 }
  0xd3   :  { %1247 = vmatprep.mubr.msk.bf16.mxu1 %vm1441_vm0, %v1440_v25 }
  0xda   :  { %1248 = vmatmul.mubr.bf16.gmra.mrb[64].mxu1 %v1544_v60 }
  0xdb   :  { %1251 = vmatprep.mubr.msk.bf16.mxu1 %vm1441_vm0, %v1440_v25 }
  0xe2   :  { %1252 = vmatmul.mubr.bf16.gmra.mrb[68].mxu1 %v99_v4 }
  0xe3   :  { %1255 = vmatprep.mubr.msk.bf16.mxu1 %vm1441_vm0, %v1440_v25 }
  0xea   :  { %1256 = vmatmul.mubr.bf16.gmra.mrb[72].mxu1 %v100_v9 }
 0x12d   :  { %v295_v23 = vpop.f32.mrb[0].mxu0  ;;  %v365_v24 = vpop.f32.mrb[0].mxu1 }
 0x12e   :  { %v570_v26 = vadd.f32 %v1590_v21, %v295_v23  ;;  %v297_v27 = vpop.f32.mrb[1].mxu0  ;;  %v598_v25 = vadd.f32 %v1590_v21, %v365_v24  ;;  %v367_v28 = vpop.f32.mrb[1].mxu1 }
 0x12f   :  { %v571_v29 = vadd.f32 %v1592_v22, %v297_v27  ;;  %v299_v30 = vpop.f32.mrb[2].mxu0  ;;  %v599_v31 = vadd.f32 %v1592_v22, %v367_v28  ;;  %v369_v32 = vpop.f32.mrb[2].mxu1 }
 0x130   :  { %v572_v33 = vadd.f32 %v1590_v21, %v299_v30  ;;  %v301_v34 = vpop.f32.mrb[3].mxu0  ;;  %v648_v35 = vand.u32 2147483647, %v598_v25  ;;  %v600_v36 = vadd.f32 %v1590_v21, %v369_v32  ;;  %v371_v37 = vpop.f32.mrb[3].mxu1  ;;  %v620_v41 = vand.u32 2147483647, %v570_v26 }
 0x131   :  { %v573_v38 = vadd.f32 %v1592_v22, %v301_v34  ;;  %v649_v39 = vand.u32 2147483647, %v599_v31  ;;  %v601_v40 = vadd.f32 %v1592_v22, %v371_v37  ;;  %v621_v44 = vand.u32 2147483647, %v571_v29 }
 0x132   :  { %v622_v42 = vand.u32 2147483647, %v572_v33  ;;  %v650_v43 = vand.u32 2147483647, %v600_v36 }
 0x133   :  { %v623_v45 = vand.u32 2147483647, %v573_v38  ;;  %v651_v46 = vand.u32 2147483647, %v601_v40 }
 0x134   :  { %v670_v47 = vpack.c.bf16 %v622_v42, %v620_v41  ;;  %v1602_v48 = vpack.c.bf16 %v650_v43, %v648_v35 }
 0x135   :  { %v671_v49 = vpack.c.bf16 %v623_v45, %v621_v44  ;;  %v305_v50 = vpop.f32.mrb[4].mxu0  ;;  %v1604_v51 = vpack.c.bf16 %v651_v46, %v649_v39  ;;  %v375_v52 = vpop.f32.mrb[4].mxu1 }
 0x136   :  { %v574_v53 = vadd.f32 %v1590_v21, %v305_v50  ;;  %v307_v54 = vpop.f32.mrb[5].mxu0  ;;  %v602_v55 = vadd.f32 %v1590_v21, %v375_v52  ;;  %v377_v56 = vpop.f32.mrb[5].mxu1 }
 0x137   :  { %v575_v57 = vadd.f32 %v1592_v22, %v307_v54  ;;  %v309_v58 = vpop.f32.mrb[6].mxu0  ;;  %863 = vmatprep.mubr.bf16.mxu0 %v671_v49  ;;  %v603_v59 = vadd.f32 %v1592_v22, %v377_v56  ;;  %v379_v60 = vpop.f32.mrb[6].mxu1 }
 0x138   :  { %v576_v61 = vadd.f32 %v1590_v21, %v309_v58  ;;  %v311_v62 = vpop.f32.mrb[7].mxu0  ;;  %864 = vmatmul.mubr.bf16.vlgmr.msra.gmra.mrb[28].mxu0 %v670_v47  ;;  %v652_v63 = vand.u32 2147483647, %v602_v55  ;;  %v604_v1 = vadd.f32 %v1590_v21, %v379_v60  ;;  %v381_v2 = vpop.f32.mrb[7].mxu1  ;;  %v624_v6 = vand.u32 2147483647, %v574_v53 }
 0x139   :  { %v577_v3 = vadd.f32 %v1592_v22, %v311_v62  ;;  %v653_v4 = vand.u32 2147483647, %v603_v59  ;;  %v605_v5 = vadd.f32 %v1592_v22, %v381_v2  ;;  %v625_v9 = vand.u32 2147483647, %v575_v57 }
 0x13a   :  { %v626_v7 = vand.u32 2147483647, %v576_v61  ;;  %v654_v8 = vand.u32 2147483647, %v604_v1 }
 0x13b   :  { %v627_v10 = vand.u32 2147483647, %v577_v3  ;;  %v655_v11 = vand.u32 2147483647, %v605_v5 }
 0x13c   :  { %v672_v12 = vpack.c.bf16 %v626_v7, %v624_v6  ;;  %v1614_v13 = vpack.c.bf16 %v654_v8, %v652_v63 }
 0x13d   :  { %v673_v14 = vpack.c.bf16 %v627_v10, %v625_v9  ;;  %v315_v15 = vpop.f32.mrb[8].mxu0  ;;  %v1616_v16 = vpack.c.bf16 %v655_v11, %v653_v4  ;;  %v385_v0 = vpop.f32.mrb[8].mxu1 }
 0x13e   :  { %v578_v17 = vadd.f32 %v1590_v21, %v315_v15  ;;  %v317_v18 = vpop.f32.mrb[9].mxu0  ;;  %v606_v19 = vadd.f32 %v1590_v21, %v385_v0  ;;  %v387_v20 = vpop.f32.mrb[9].mxu1 }
 0x13f   :  { %v579_v23 = vadd.f32 %v1592_v22, %v317_v18  ;;  %v319_v24 = vpop.f32.mrb[10].mxu0  ;;  %871 = vmatprep.mubr.bf16.mxu0 %v673_v14  ;;  %v607_v26 = vadd.f32 %v1592_v22, %v387_v20  ;;  %v389_v27 = vpop.f32.mrb[10].mxu1 }
 0x140   :  { %v580_v25 = vadd.f32 %v1590_v21, %v319_v24  ;;  %v321_v28 = vpop.f32.mrb[11].mxu0  ;;  %872 = vmatmul.mubr.bf16.gmra.mrb[32].mxu0 %v672_v12  ;;  %v656_v29 = vand.u32 2147483647, %v606_v19  ;;  %v608_v30 = vadd.f32 %v1590_v21, %v389_v27  ;;  %v391_v31 = vpop.f32.mrb[11].mxu1  ;;  %v628_v35 = vand.u32 2147483647, %v578_v17 }
 0x141   :  { %v581_v32 = vadd.f32 %v1592_v22, %v321_v28  ;;  %v657_v33 = vand.u32 2147483647, %v607_v26  ;;  %v609_v34 = vadd.f32 %v1592_v22, %v391_v31  ;;  %v629_v38 = vand.u32 2147483647, %v579_v23 }
 0x142   :  { %v630_v36 = vand.u32 2147483647, %v580_v25  ;;  %v658_v37 = vand.u32 2147483647, %v608_v30 }
 0x143   :  { %v631_v39 = vand.u32 2147483647, %v581_v32  ;;  %v659_v40 = vand.u32 2147483647, %v609_v34 }
 0x144   :  { %v674_v41 = vpack.c.bf16 %v630_v36, %v628_v35  ;;  %v1626_v42 = vpack.c.bf16 %v658_v37, %v656_v29 }
 0x145   :  { %v675_v43 = vpack.c.bf16 %v631_v39, %v629_v38  ;;  %v325_v44 = vpop.f32.mrb[12].mxu0  ;;  %v1628_v45 = vpack.c.bf16 %v659_v40, %v657_v33  ;;  %v395_v46 = vpop.f32.mrb[12].mxu1 }
 0x146   :  { %v582_v47 = vadd.f32 %v1590_v21, %v325_v44  ;;  %v327_v49 = vpop.f32.mrb[13].mxu0  ;;  %v610_v50 = vadd.f32 %v1590_v21, %v395_v46  ;;  %v397_v52 = vpop.f32.mrb[13].mxu1 }
 0x147   :  { %v583_v53 = vadd.f32 %v1592_v22, %v327_v49  ;;  %v329_v54 = vpop.f32.mrb[14].mxu0  ;;  %879 = vmatprep.mubr.bf16.mxu0 %v675_v43  ;;  %v611_v55 = vadd.f32 %v1592_v22, %v397_v52  ;;  %v399_v56 = vpop.f32.mrb[14].mxu1 }
 0x148   :  { %v584_v57 = vadd.f32 %v1590_v21, %v329_v54  ;;  %v331_v58 = vpop.f32.mrb[15].mxu0  ;;  %880 = vmatmul.mubr.bf16.gmra.mrb[36].mxu0 %v674_v41  ;;  %v660_v59 = vand.u32 2147483647, %v610_v50  ;;  %v612_v60 = vadd.f32 %v1590_v21, %v399_v56  ;;  %v401_v61 = vpop.f32.mrb[15].mxu1  ;;  %v632_v2 = vand.u32 2147483647, %v582_v47 }
 0x149   :  { %v585_v62 = vadd.f32 %v1592_v22, %v331_v58  ;;  %v661_v63 = vand.u32 2147483647, %v611_v55  ;;  %v613_v1 = vadd.f32 %v1592_v22, %v401_v61  ;;  %v633_v5 = vand.u32 2147483647, %v583_v53 }
 0x14a   :  { %v634_v3 = vand.u32 2147483647, %v584_v57  ;;  %v662_v4 = vand.u32 2147483647, %v612_v60 }
 0x14b   :  { %v635_v6 = vand.u32 2147483647, %v585_v62  ;;  %v663_v7 = vand.u32 2147483647, %v613_v1 }
 0x14c   :  { %v676_v8 = vpack.c.bf16 %v634_v3, %v632_v2  ;;  %v1638_v9 = vpack.c.bf16 %v662_v4, %v660_v59 }
 0x14d   :  { %v677_v10 = vpack.c.bf16 %v635_v6, %v633_v5  ;;  %v335_v11 = vpop.f32.mrb[16].mxu0  ;;  %v1640_v12 = vpack.c.bf16 %v663_v7, %v661_v63  ;;  %v405_v14 = vpop.f32.mrb[16].mxu1 }
 0x14e   :  { %v586_v15 = vadd.f32 %v1590_v21, %v335_v11  ;;  %v337_v0 = vpop.f32.mrb[17].mxu0  ;;  %v614_v17 = vadd.f32 %v1590_v21, %v405_v14  ;;  %v407_v18 = vpop.f32.mrb[17].mxu1 }
 0x14f   :  { %v587_v19 = vadd.f32 %v1592_v22, %v337_v0  ;;  %v339_v20 = vpop.f32.mrb[18].mxu0  ;;  %887 = vmatprep.mubr.bf16.mxu0 %v677_v10  ;;  %v615_v23 = vadd.f32 %v1592_v22, %v407_v18  ;;  %v409_v24 = vpop.f32.mrb[18].mxu1 }
 0x150   :  { %v588_v26 = vadd.f32 %v1590_v21, %v339_v20  ;;  %v341_v27 = vpop.f32.mrb[19].mxu0  ;;  %888 = vmatmul.mubr.bf16.gmra.mrb[40].mxu0 %v676_v8  ;;  %v664_v25 = vand.u32 2147483647, %v614_v17  ;;  %v616_v28 = vadd.f32 %v1590_v21, %v409_v24  ;;  %v411_v29 = vpop.f32.mrb[19].mxu1  ;;  %v636_v33 = vand.u32 2147483647, %v586_v15 }
 0x151   :  { %v589_v30 = vadd.f32 %v1592_v22, %v341_v27  ;;  %v665_v31 = vand.u32 2147483647, %v615_v23  ;;  %v617_v32 = vadd.f32 %v1592_v22, %v411_v29  ;;  %v637_v36 = vand.u32 2147483647, %v587_v19 }
 0x152   :  { %v638_v34 = vand.u32 2147483647, %v588_v26  ;;  %v666_v35 = vand.u32 2147483647, %v616_v28 }
 0x153   :  { %v639_v37 = vand.u32 2147483647, %v589_v30  ;;  %v667_v38 = vand.u32 2147483647, %v617_v32 }
 0x154   :  { %v678_v39 = vpack.c.bf16 %v638_v34, %v636_v33  ;;  %v692_v40 = vpack.c.bf16 %v666_v35, %v664_v25 }
 0x155   :  { %v679_v41 = vpack.c.bf16 %v639_v37, %v637_v36  ;;  %v345_v43 = vpop.f32.mrb[20].mxu0  ;;  %v693_v44 = vpack.c.bf16 %v667_v38, %v665_v31  ;;  %v415_v46 = vpop.f32.mrb[20].mxu1 }
 0x156   :  { %v590_v47 = vadd.f32 %v1590_v21, %v345_v43  ;;  %v347_v49 = vpop.f32.mrb[21].mxu0  ;;  %v618_v50 = vadd.f32 %v1590_v21, %v415_v46  ;;  %v417_v52 = vpop.f32.mrb[21].mxu1 }
 0x157   :  { %v591_v53 = vadd.f32 %v1592_v22, %v347_v49  ;;  %v349_v54 = vpop.f32.mrb[22].mxu0  ;;  %895 = vmatprep.mubr.bf16.mxu0 %v679_v41  ;;  %v619_v55 = vadd.f32 %v1592_v22, %v417_v52  ;;  %v419_v56 = vpop.f32.mrb[22].mxu1 }
 0x158   :  { %v592_v57 = vadd.f32 %v1590_v21, %v349_v54  ;;  %v351_v58 = vpop.f32.mrb[23].mxu0  ;;  %896 = vmatmul.mubr.bf16.gmra.mrb[44].mxu0 %v678_v39  ;;  %v420_v59 = vpop.f32.mrb[23].mxu1  ;;  %v640_v61 = vand.u32 2147483647, %v590_v47 }
 0x159   :  { %v593_v60 = vadd.f32 %v1592_v22, %v351_v58  ;;  %v641_v63 = vand.u32 2147483647, %v591_v53 }
 0x15a   :  { %v642_v62 = vand.u32 2147483647, %v592_v57 }
 0x15b   :  { %v643_v1 = vand.u32 2147483647, %v593_v60 }
 0x15c   :  { %v680_v2 = vpack.c.bf16 %v642_v62, %v640_v61 }
 0x15d   :  { %v681_v3 = vpack.c.bf16 %v643_v1, %v641_v63  ;;  %v355_v4 = vpop.f32.mrb[24].mxu0  ;;  %v1668_v23 = vpop.f32.mrb[24].mxu1 }
 0x15e   :  { %v594_v5 = vadd.f32 %v1590_v21, %v355_v4  ;;  %v357_v6 = vpop.f32.mrb[25].mxu0 }
 0x15f   :  { %v595_v7 = vadd.f32 %v1592_v22, %v357_v6  ;;  %v359_v8 = vpop.f32.mrb[26].mxu0  ;;  %903 = vmatprep.mubr.bf16.mxu0 %v681_v3 }
 0x160   :  { %v596_v10 = vadd.f32 %v1590_v21, %v359_v8  ;;  %v361_v11 = vpop.f32.mrb[27].mxu0  ;;  %904 = vmatmul.mubr.bf16.gmra.mrb[48].mxu0 %v680_v2  ;;  %v644_v15 = vand.u32 2147483647, %v594_v5  ;;  %v669_v21 = vand.u32 2147483647, %v619_v55 }
 0x161   :  { %v597_v14 = vadd.f32 %v1592_v22, %v361_v11  ;;  %v645_v17 = vand.u32 2147483647, %v595_v7 }
 0x162   :  { %v646_v0 = vand.u32 2147483647, %v596_v10  ;;  %v695_v22 = vpack.c.bf16 %v669_v21, %v669_v21 }
 0x163   :  { %v647_v18 = vand.u32 2147483647, %v597_v14 }
 0x164   :  { %v682_v19 = vpack.c.bf16 %v646_v0, %v644_v15  ;;  %v1721_v15 = vld [vmem:[%s1792_s4] ss:$0 sm:$0xff]  ;;  %s1442_s4 = smov [#allocation8]  }
 0x165   :  { %v683_v20 = vpack.c.bf16 %v647_v18, %v645_v17  ;;  %s1022_s10 = sshll.u32 %s1442_s4, 4  ;;  %s1023_s10 = int_to_ptr.vmem [resolvable:$true] %s1022_s10 }
 0x166   :  { %s1402_s11 = scalar_lea.vmem %s1023_s10, 3200  ;;  %p1407_p11 = scmp.lt.s32.totalorder %s1023_s10, %s1023_s10 }
 0x167   :  { %911 = vmatprep.mubr.bf16.mxu0 %v683_v20  ;;  %p1403_p10 = scmp.ne.s32.totalorder %s1023_s10, %s1402_s11  ;;  %p1408_p12 = scmp.lt.s32.totalorder %s1402_s11, %s1402_s11 }
 0x168   :  { %912 = vmatmul.mubr.bf16.gmra.mrb[52].mxu0 %v682_v19 }
 0x169   :  { %919 = vmatprep.mubr.bf16.mxu0 %v1604_v51  ;;  %v1209_v51 = vpop.f32.mrb[25].mxu1  ;;  %p1409_p13 = por %p1408_p12, %p1407_p11 }
 0x16a   :  { %v1670_v24 = vpop.f32.mrb[26].mxu1 }
 0x16b   :  { %p1410_p0 = pnand %p1409_p13, %p1403_p10 }
 0x170   :  { %920 = vmatmul.mubr.bf16.gmra.mrb[56].mxu0 %v1602_v48  ;;  %v1210_v48 = vpop.f32.mrb[27].mxu1 }
 0x171   :  { %927 = vmatprep.mubr.bf16.mxu0 %v1616_v16  ;;  %v1672_v16 = vpop.f32.mrb[28].mxu1 }
 0x178   :  { %928 = vmatmul.mubr.bf16.gmra.mrb[60].mxu0 %v1614_v13  ;;  %v668_v13 = vand.u32 2147483647, %v618_v50 }
 0x179   :  { %935 = vmatprep.mubr.bf16.mxu0 %v1628_v45 }
 0x17a   :  { %v694_v45 = vpack.c.bf16 %v668_v13, %v668_v13 }
 0x180   :  { %936 = vmatmul.mubr.bf16.gmra.mrb[64].mxu0 %v1626_v42  ;;  %v1213_v42 = vpop.f32.mrb[29].mxu1 }
 0x181   :  { %943 = vmatprep.mubr.bf16.mxu0 %v1640_v12  ;;  %v1674_v26 = vpop.f32.mrb[30].mxu1 }
 0x188   :  { %944 = vmatmul.mubr.bf16.gmra.mrb[68].mxu0 %v1638_v9  ;;  %v1214_v9 = vpop.f32.mrb[31].mxu1 }
 0x189   :  { %951 = vmatprep.mubr.bf16.mxu0 %v693_v44  ;;  %v1676_v12 = vpop.f32.mrb[32].mxu1 }
 0x18a   :  { %v1217_v27 = vpop.f32.mrb[33].mxu1 }
 0x18b   :  { %v1678_v25 = vpop.f32.mrb[34].mxu1 }
 0x18c   :  { %v1218_v28 = vpop.f32.mrb[35].mxu1 }
 0x18d   :  { %v1680_v29 = vpop.f32.mrb[36].mxu1 }
 0x18e   :  { %v1221_v30 = vpop.f32.mrb[37].mxu1 }
 0x18f   :  { %v1682_v31 = vpop.f32.mrb[38].mxu1 }
 0x190   :  { %952 = vmatmul.mubr.bf16.gmra.mrb[72].mxu0 %v692_v40  ;;  %v1222_v32 = vpop.f32.mrb[39].mxu1 }
 0x191   :  { %959 = vmatprep.mubr.bf16.mxu0 %v695_v22  ;;  %v1684_v33 = vpop.f32.mrb[40].mxu1 }
 0x192   :  { %v1225_v34 = vpop.f32.mrb[41].mxu1 }
 0x193   :  { %v1686_v35 = vpop.f32.mrb[42].mxu1 }
 0x194   :  { %v1226_v36 = vpop.f32.mrb[43].mxu1 }
 0x195   :  { %v1688_v37 = vpop.f32.mrb[44].mxu1 }
 0x196   :  { %v1229_v38 = vpop.f32.mrb[45].mxu1 }
 0x197   :  { %v1690_v39 = vpop.f32.mrb[46].mxu1 }
 0x198   :  { %960 = vmatmul.mubr.bf16.gmra.mrb[76].mxu0 %v694_v45  ;;  %v1230_v40 = vpop.f32.mrb[47].mxu1 }
 0x199   :  { %v1692_v41 = vpop.f32.mrb[48].mxu1 }
 0x19a   :  { %v1233_v43 = vpop.f32.mrb[49].mxu1 }
 0x19b   :  { %v1694_v44 = vpop.f32.mrb[50].mxu1 }
 0x19c   :  { %v1234_v46 = vpop.f32.mrb[51].mxu1 }
 0x19d   :  { %v1696_v47 = vpop.f32.mrb[52].mxu1 }
 0x19e   :  { %v1237_v49 = vpop.f32.mrb[53].mxu1 }
 0x19f   :  { %v1698_v50 = vpop.f32.mrb[54].mxu1 }
 0x1a0   :  { %v1238_v52 = vpop.f32.mrb[55].mxu1 }
 0x1a1   :  { %v1700_v53 = vpop.f32.mrb[56].mxu1 }
 0x1a2   :  { %v1241_v54 = vpop.f32.mrb[57].mxu1 }
 0x1a3   :  { %v1702_v55 = vpop.f32.mrb[58].mxu1 }
 0x1a4   :  { %v1242_v56 = vpop.f32.mrb[59].mxu1 }
 0x1a5   :  { %v1704_v57 = vpop.f32.mrb[60].mxu1 }
 0x1a6   :  { %v1245_v58 = vpop.f32.mrb[61].mxu1 }
 0x1a7   :  { %v1706_v59 = vpop.f32.mrb[62].mxu1 }
 0x1a8   :  { %v1246_v60 = vpop.f32.mrb[63].mxu1 }
 0x1ad   :  { %v1708_v61 = vpop.f32.mrb[64].mxu1 }
 0x1ae   :  { %v1249_v62 = vpop.f32.mrb[65].mxu1 }
 0x1af   :  { %v1710_v63 = vpop.f32.mrb[66].mxu1 }
 0x1b0   :  { %v1250_v1 = vpop.f32.mrb[67].mxu1 }
 0x1b5   :  { %v1712_v2 = vpop.f32.mrb[68].mxu1 }
 0x1b6   :  { %v1253_v3 = vpop.f32.mrb[69].mxu1 }
 0x1b7   :  { %v1714_v4 = vpop.f32.mrb[70].mxu1 }
 0x1b8   :  { %v1254_v5 = vpop.f32.mrb[71].mxu1 }
 0x1bd   :  { %v1716_v6 = vpop.f32.mrb[72].mxu1 }
 0x1be   :  { %v1257_v7 = vpop.f32.mrb[73].mxu1 }
 0x1bf   :  { %v555_v8 = vpop.f32.mrb[74].mxu1 }
 0x1c0   :  { %v1258_v10 = vpop.f32.mrb[75].mxu1 }
 0x20b   :  { %v1113_v11 = vpop.f32.mrb[28].mxu0 }
 0x20c   :  { %v1114_v14 = vpop.f32.mrb[29].mxu0 }
 0x20d   :  { %v1115_v0 = vadd.f32 %v1114_v14, %v1113_v11  ;;  %v1116_v17 = vpop.f32.mrb[30].mxu0 }
 0x20e   :  { %v1117_v18 = vpop.f32.mrb[31].mxu0 }
 0x20f   :  { %v866_v19 = vadd.f32 %v1115_v0, %v1721_v15  ;;  %v1118_v20 = vadd.f32 %v1117_v18, %v1116_v17 }
 0x211   :  { %v967_v21 = vadd.f32 %v866_v19, %v1668_v23  ;;  %v869_v22 = vadd.f32 %v1118_v20, %v1721_v15 }
 0x213   :  { %992 = vst [vmem:[#allocation8] sm:$0xff] %v967_v21  ;;  %v968_v51 = vadd.f32 %v869_v22, %v1670_v24  ;;  %v1119_v48 = vpop.f32.mrb[32].mxu0 }
 0x214   :  { %v1120_v13 = vpop.f32.mrb[33].mxu0 }
 0x215   :  { %993 = vst [vmem:[#allocation8 + $0x8] sm:$0xff] %v968_v51  ;;  %v1121_v45 = vadd.f32 %v1120_v13, %v1119_v48  ;;  %v1122_v42 = vpop.f32.mrb[34].mxu0 }
 0x216   :  { %v1123_v9 = vpop.f32.mrb[35].mxu0 }
 0x217   :  { %v874_v27 = vadd.f32 %v1121_v45, %v1721_v15  ;;  %v1124_v28 = vadd.f32 %v1123_v9, %v1122_v42 }
 0x219   :  { %v969_v30 = vadd.f32 %v874_v27, %v1672_v16  ;;  %v877_v32 = vadd.f32 %v1124_v28, %v1721_v15 }
 0x21b   :  { %994 = vst [vmem:[#allocation8 + $0x10] sm:$0xff] %v969_v30  ;;  %v970_v23 = vadd.f32 %v877_v32, %v1674_v26  ;;  %v1125_v34 = vpop.f32.mrb[36].mxu0 }
 0x21c   :  { %v1126_v36 = vpop.f32.mrb[37].mxu0 }
 0x21d   :  { %995 = vst [vmem:[#allocation8 + $0x18] sm:$0xff] %v970_v23  ;;  %v1127_v24 = vadd.f32 %v1126_v36, %v1125_v34  ;;  %v1128_v38 = vpop.f32.mrb[38].mxu0 }
 0x21e   :  { %v1129_v40 = vpop.f32.mrb[39].mxu0 }
 0x21f   :  { %v882_v43 = vadd.f32 %v1127_v24, %v1721_v15  ;;  %v1130_v46 = vadd.f32 %v1129_v40, %v1128_v38 }
 0x221   :  { %v971_v49 = vadd.f32 %v882_v43, %v1676_v12  ;;  %v885_v52 = vadd.f32 %v1130_v46, %v1721_v15 }
 0x223   :  { %996 = vst [vmem:[#allocation8 + $0x20] sm:$0xff] %v971_v49  ;;  %v972_v16 = vadd.f32 %v885_v52, %v1678_v25  ;;  %v1131_v54 = vpop.f32.mrb[40].mxu0 }
 0x224   :  { %v1132_v56 = vpop.f32.mrb[41].mxu0 }
 0x225   :  { %997 = vst [vmem:[#allocation8 + $0x28] sm:$0xff] %v972_v16  ;;  %v1133_v26 = vadd.f32 %v1132_v56, %v1131_v54  ;;  %v1134_v58 = vpop.f32.mrb[42].mxu0 }
 0x226   :  { %v1135_v60 = vpop.f32.mrb[43].mxu0 }
 0x227   :  { %v890_v62 = vadd.f32 %v1133_v26, %v1721_v15  ;;  %v1136_v1 = vadd.f32 %v1135_v60, %v1134_v58 }
 0x229   :  { %v973_v3 = vadd.f32 %v890_v62, %v1680_v29  ;;  %v893_v5 = vadd.f32 %v1136_v1, %v1721_v15 }
 0x22b   :  { %998 = vst [vmem:[#allocation8 + $0x30] sm:$0xff] %v973_v3  ;;  %v974_v12 = vadd.f32 %v893_v5, %v1682_v31  ;;  %v1137_v7 = vpop.f32.mrb[44].mxu0 }
 0x22c   :  { %v1138_v8 = vpop.f32.mrb[45].mxu0 }
 0x22d   :  { %999 = vst [vmem:[#allocation8 + $0x38] sm:$0xff] %v974_v12  ;;  %v1139_v25 = vadd.f32 %v1138_v8, %v1137_v7  ;;  %v1140_v10 = vpop.f32.mrb[46].mxu0 }
 0x22e   :  { %v1141_v11 = vpop.f32.mrb[47].mxu0 }
 0x22f   :  { %v898_v14 = vadd.f32 %v1139_v25, %v1721_v15  ;;  %v1142_v0 = vadd.f32 %v1141_v11, %v1140_v10 }
 0x231   :  { %v975_v17 = vadd.f32 %v898_v14, %v1684_v33  ;;  %v901_v18 = vadd.f32 %v1142_v0, %v1721_v15 }
 0x233   :  { %1000 = vst [vmem:[#allocation8 + $0x40] sm:$0xff] %v975_v17  ;;  %v976_v29 = vadd.f32 %v901_v18, %v1686_v35  ;;  %v1143_v19 = vpop.f32.mrb[48].mxu0 }
 0x234   :  { %v1144_v20 = vpop.f32.mrb[49].mxu0 }
 0x235   :  { %1001 = vst [vmem:[#allocation8 + $0x48] sm:$0xff] %v976_v29  ;;  %v1145_v31 = vadd.f32 %v1144_v20, %v1143_v19  ;;  %v1146_v21 = vpop.f32.mrb[50].mxu0 }
 0x236   :  { %v1147_v22 = vpop.f32.mrb[51].mxu0 }
 0x237   :  { %v906_v51 = vadd.f32 %v1145_v31, %v1721_v15  ;;  %v1148_v48 = vadd.f32 %v1147_v22, %v1146_v21 }
 0x239   :  { %v977_v13 = vadd.f32 %v906_v51, %v1688_v37  ;;  %v909_v45 = vadd.f32 %v1148_v48, %v1721_v15 }
 0x23b   :  { %1002 = vst [vmem:[#allocation8 + $0x50] sm:$0xff] %v977_v13  ;;  %v978_v33 = vadd.f32 %v909_v45, %v1690_v39  ;;  %v1149_v42 = vpop.f32.mrb[52].mxu0 }
 0x23c   :  { %v1150_v9 = vpop.f32.mrb[53].mxu0 }
 0x23d   :  { %1003 = vst [vmem:[#allocation8 + $0x58] sm:$0xff] %v978_v33  ;;  %v1151_v35 = vadd.f32 %v1150_v9, %v1149_v42  ;;  %v1152_v27 = vpop.f32.mrb[54].mxu0 }
 0x23e   :  { %v1153_v28 = vpop.f32.mrb[55].mxu0 }
 0x23f   :  { %v914_v30 = vadd.f32 %v1151_v35, %v1721_v15  ;;  %v1154_v32 = vadd.f32 %v1153_v28, %v1152_v27 }
 0x241   :  { %v979_v23 = vadd.f32 %v914_v30, %v1692_v41  ;;  %v917_v34 = vadd.f32 %v1154_v32, %v1721_v15 }
 0x243   :  { %1004 = vst [vmem:[#allocation8 + $0x60] sm:$0xff] %v979_v23  ;;  %v980_v37 = vadd.f32 %v917_v34, %v1694_v44  ;;  %v1155_v36 = vpop.f32.mrb[56].mxu0 }
 0x244   :  { %v1156_v24 = vpop.f32.mrb[57].mxu0 }
 0x245   :  { %1005 = vst [vmem:[#allocation8 + $0x68] sm:$0xff] %v980_v37  ;;  %v1157_v39 = vadd.f32 %v1156_v24, %v1155_v36  ;;  %v1158_v38 = vpop.f32.mrb[58].mxu0 }
 0x246   :  { %v1159_v40 = vpop.f32.mrb[59].mxu0 }
 0x247   :  { %v922_v43 = vadd.f32 %v1157_v39, %v1721_v15  ;;  %v1160_v46 = vadd.f32 %v1159_v40, %v1158_v38 }
 0x249   :  { %v981_v49 = vadd.f32 %v922_v43, %v1696_v47  ;;  %v925_v52 = vadd.f32 %v1160_v46, %v1721_v15 }
 0x24b   :  { %1006 = vst [vmem:[#allocation8 + $0x70] sm:$0xff] %v981_v49  ;;  %v982_v41 = vadd.f32 %v925_v52, %v1698_v50  ;;  %v1161_v16 = vpop.f32.mrb[60].mxu0 }
 0x24c   :  { %v1162_v54 = vpop.f32.mrb[61].mxu0 }
 0x24d   :  { %1007 = vst [vmem:[#allocation8 + $0x78] sm:$0xff] %v982_v41  ;;  %v1163_v44 = vadd.f32 %v1162_v54, %v1161_v16  ;;  %v1164_v56 = vpop.f32.mrb[62].mxu0 }
 0x24e   :  { %v1165_v26 = vpop.f32.mrb[63].mxu0 }
 0x24f   :  { %v930_v58 = vadd.f32 %v1163_v44, %v1721_v15  ;;  %v1166_v60 = vadd.f32 %v1165_v26, %v1164_v56 }
 0x251   :  { %v983_v62 = vadd.f32 %v930_v58, %v1700_v53  ;;  %v933_v1 = vadd.f32 %v1166_v60, %v1721_v15 }
 0x253   :  { %1008 = vst [vmem:[#allocation8 + $0x80] sm:$0xff] %v983_v62  ;;  %v984_v47 = vadd.f32 %v933_v1, %v1702_v55  ;;  %v1167_v3 = vpop.f32.mrb[64].mxu0 }
 0x254   :  { %v1168_v5 = vpop.f32.mrb[65].mxu0 }
 0x255   :  { %1009 = vst [vmem:[#allocation8 + $0x88] sm:$0xff] %v984_v47  ;;  %v1169_v50 = vadd.f32 %v1168_v5, %v1167_v3  ;;  %v1170_v12 = vpop.f32.mrb[66].mxu0 }
 0x256   :  { %v1171_v7 = vpop.f32.mrb[67].mxu0 }
 0x257   :  { %v938_v8 = vadd.f32 %v1169_v50, %v1721_v15  ;;  %v1172_v25 = vadd.f32 %v1171_v7, %v1170_v12 }
 0x259   :  { %v985_v10 = vadd.f32 %v938_v8, %v1704_v57  ;;  %v941_v11 = vadd.f32 %v1172_v25, %v1721_v15 }
 0x25b   :  { %1010 = vst [vmem:[#allocation8 + $0x90] sm:$0xff] %v985_v10  ;;  %v986_v53 = vadd.f32 %v941_v11, %v1706_v59  ;;  %v1173_v14 = vpop.f32.mrb[68].mxu0 }
 0x25c   :  { %v1174_v0 = vpop.f32.mrb[69].mxu0 }
 0x25d   :  { %1011 = vst [vmem:[#allocation8 + $0x98] sm:$0xff] %v986_v53  ;;  %v1175_v55 = vadd.f32 %v1174_v0, %v1173_v14  ;;  %v1176_v17 = vpop.f32.mrb[70].mxu0 }
 0x25e   :  { %v1177_v18 = vpop.f32.mrb[71].mxu0 }
 0x25f   :  { %v946_v29 = vadd.f32 %v1175_v55, %v1721_v15  ;;  %v1178_v19 = vadd.f32 %v1177_v18, %v1176_v17 }
 0x261   :  { %v987_v20 = vadd.f32 %v946_v29, %v1708_v61  ;;  %v949_v31 = vadd.f32 %v1178_v19, %v1721_v15 }
 0x263   :  { %1012 = vst [vmem:[#allocation8 + $0xa0] sm:$0xff] %v987_v20  ;;  %v988_v57 = vadd.f32 %v949_v31, %v1710_v63  ;;  %v1179_v21 = vpop.f32.mrb[72].mxu0 }
 0x264   :  { %v1180_v22 = vpop.f32.mrb[73].mxu0 }
 0x265   :  { %1013 = vst [vmem:[#allocation8 + $0xa8] sm:$0xff] %v988_v57  ;;  %v1181_v59 = vadd.f32 %v1180_v22, %v1179_v21  ;;  %v1182_v51 = vpop.f32.mrb[74].mxu0 }
 0x266   :  { %v1183_v48 = vpop.f32.mrb[75].mxu0 }
 0x267   :  { %v954_v13 = vadd.f32 %v1181_v59, %v1721_v15  ;;  %v1184_v45 = vadd.f32 %v1183_v48, %v1182_v51 }
 0x269   :  { %v989_v33 = vadd.f32 %v954_v13, %v1712_v2  ;;  %v957_v42 = vadd.f32 %v1184_v45, %v1721_v15 }
 0x26b   :  { %1014 = vst [vmem:[#allocation8 + $0xb0] sm:$0xff] %v989_v33  ;;  %v990_v61 = vadd.f32 %v957_v42, %v1714_v4  ;;  %v1185_v9 = vpop.f32.mrb[76].mxu0 }
 0x26c   :  { %v1186_v35 = vpop.f32.mrb[77].mxu0 }
 0x26d   :  { %1015 = vst [vmem:[#allocation8 + $0xb8] sm:$0xff] %v990_v61  ;;  %v1187_v63 = vadd.f32 %v1186_v35, %v1185_v9  ;;  %v1188_v27 = vpop.f32.mrb[78].mxu0 }
 0x26e   :  { %v1189_v28 = vpop.f32.mrb[79].mxu0 }
 0x26f   :  { %v962_v30 = vadd.f32 %v1187_v63, %v1721_v15 }
 0x271   :  { %v991_v32 = vadd.f32 %v962_v30, %v1716_v6 }
 0x273   :  { %1016 = vst [vmem:[#allocation8 + $0xc0] sm:$0xff] %v991_v32 }
 0x274   :  { %1413 = shalt.err (!%p1410_p0)
}
 0x275   :  { %s1414_s14 = scalar_lea.hbm %s1793_s5, 3200 }
 0x276   :  { %p1415_p1 = scmp.ne.s32.totalorder %s1793_s5, %s1414_s14  ;;  %p1418_p2 = scmp.lt.u32.totalorder %s1414_s14, %s1793_s5 }
 0x278   :  { %p1420_p3 = pnand %p1418_p2, %p1415_p1 }
 0x27a   :  { %1423 = shalt.err (!%p1420_p3)
}
 0x27b   :  { %1028 = dma.vmem_to_hbm [thread:$0]  %s1023_s10, 3200, %s1793_s5, [#allocation4], %s1434_s1, %s1434_s1, %s1435_s17  }
 0x27c   :  { %1428 = dma.done.wait [#allocation4], 3200  }
 0x27d   :  { %1429 = vsyncadd [#allocation4], 4294964096 }
 0x27e   :  { %1032 = vsyncpa [#allocation3], 1 }
 0x27f   :  { %1033 = vsyncpa [#allocation6], 1 }
 0x280   :  { %1034 = vsyncpa [#allocation4], 1 }

</bundles_post_ra>
